<compile_context>
chip_gen: v6e
topology: v6e:2x2x1
jax: 0.10.0
libtpu: 0.0.40
codegen_flags: <defaults>
</compile_context>

<pallas_src>
import functools

import jax
import jax.numpy as jnp
from jax.experimental import pallas as pl
from jax.experimental.pallas import tpu as pltpu


def _round_up(x, m):
    return ((x + m - 1) // m) * m


# ----------------------------------------------------------------------------
# Pallas tiled matmul (bf16 operands, f32 accumulation) with optional fused
# per-column sum / sum-of-squares statistics (for BatchNorm).
# ----------------------------------------------------------------------------
def _mm_kernel(a_ref, b_ref, o_ref, acc_ref):
    @pl.when(pl.program_id(2) == 0)
    def _():
        acc_ref[...] = jnp.zeros_like(acc_ref)

    acc_ref[...] += jnp.dot(a_ref[...], b_ref[...],
                            preferred_element_type=jnp.float32)

    @pl.when(pl.program_id(2) == pl.num_programs(2) - 1)
    def _():
        o_ref[...] = acc_ref[...].astype(o_ref.dtype)


def _mm_stats_kernel(a_ref, b_ref, o_ref, st_ref, acc_ref):
    @pl.when(pl.program_id(2) == 0)
    def _():
        acc_ref[...] = jnp.zeros_like(acc_ref)

    acc_ref[...] += jnp.dot(a_ref[...], b_ref[...],
                            preferred_element_type=jnp.float32)

    @pl.when(pl.program_id(2) == pl.num_programs(2) - 1)
    def _():
        acc = acc_ref[...]
        o_ref[...] = acc.astype(o_ref.dtype)
        colsum = jnp.sum(acc, axis=0, keepdims=True)        # (1, tn)
        colssq = jnp.sum(acc * acc, axis=0, keepdims=True)   # (1, tn)
        row = jax.lax.broadcasted_iota(jnp.int32, (8, acc.shape[1]), 0)
        st_ref[...] = jnp.where(row == 0, colsum,
                                jnp.where(row == 1, colssq, 0.0))


@functools.partial(jax.jit, static_argnames=("tm", "tn", "tk", "with_stats"))
def _mm_call(a_p, b_p, tm, tn, tk, with_stats):
    Mp, Kp = a_p.shape
    _, Np = b_p.shape
    gm = Mp // tm
    grid = (gm, Np // tn, Kp // tk)
    a_spec = pl.BlockSpec((tm, tk), lambda i, j, k: (i, k))
    b_spec = pl.BlockSpec((tk, tn), lambda i, j, k: (k, j))
    o_spec = pl.BlockSpec((tm, tn), lambda i, j, k: (i, j))
    cparams = pltpu.CompilerParams(
        dimension_semantics=("parallel", "parallel", "arbitrary"),
        vmem_limit_bytes=32 * 1024 * 1024)
    scratch = [pltpu.VMEM((tm, tn), jnp.float32)]
    if with_stats:
        st_spec = pl.BlockSpec((8, tn), lambda i, j, k: (i, j))
        return pl.pallas_call(
            _mm_stats_kernel,
            out_shape=(jax.ShapeDtypeStruct((Mp, Np), jnp.float32),
                       jax.ShapeDtypeStruct((gm * 8, Np), jnp.float32)),
            grid_spec=pltpu.PrefetchScalarGridSpec(
                num_scalar_prefetch=0, grid=grid,
                in_specs=[a_spec, b_spec],
                out_specs=(o_spec, st_spec),
                scratch_shapes=scratch),
            compiler_params=cparams,
        )(a_p, b_p)
    return pl.pallas_call(
        _mm_kernel,
        out_shape=jax.ShapeDtypeStruct((Mp, Np), jnp.float32),
        grid_spec=pltpu.PrefetchScalarGridSpec(
            num_scalar_prefetch=0, grid=grid,
            in_specs=[a_spec, b_spec],
            out_specs=o_spec,
            scratch_shapes=scratch),
        compiler_params=cparams,
    )(a_p, b_p)


def pallas_matmul(a, b, with_stats=False):
    """C = A @ B with bf16 MXU operands and f32 accumulation.

    If with_stats, also returns per-column sum and sum-of-squares of C (over the
    valid M rows), computed in the matmul epilogue (no extra pass over C)."""
    M, K = a.shape
    K2, N = b.shape
    assert K == K2
    a = a.astype(jnp.bfloat16)
    b = b.astype(jnp.bfloat16)

    # Adaptive tiles: 256x256 output tiles (fills the 256x256 MXUs on v6e/v7x,
    # still valid on v5e's 4x128x128), tk up to 512 chosen to divide the padded K.
    tm = min(256, _round_up(M, 16))          # bf16 sublane packing -> multiple of 16
    Mp = _round_up(M, tm)
    Np = _round_up(N, 128)
    tn = 256 if (Np % 256 == 0) else 128
    Kp = _round_up(K, 128)
    tk = min(512, Kp)
    while Kp % tk:
        tk -= 128

    a_p = jnp.pad(a, ((0, Mp - M), (0, Kp - K)))
    b_p = jnp.pad(b, ((0, Kp - K), (0, Np - N)))

    if with_stats:
        out_p, st = _mm_call(a_p, b_p, tm, tn, tk, True)
        gm = Mp // tm
        st = st.reshape(gm, 8, Np)
        colsum = jnp.sum(st[:, 0, :N], axis=0)     # padded A rows are zero -> contribute 0
        colssq = jnp.sum(st[:, 1, :N], axis=0)
        return out_p[:M, :N], colsum, colssq
    out_p = _mm_call(a_p, b_p, tm, tn, tk, False)
    return out_p[:M, :N]


# ----------------------------------------------------------------------------
# Pallas fused BN apply: scale/shift (+ residual) (+ ReLU), lane-dense, C-scaled tiles
# ----------------------------------------------------------------------------
def _affine_kernel(x_ref, s_ref, b_ref, o_ref):
    o_ref[...] = x_ref[...] * s_ref[...] + b_ref[...]


def _affine_relu_kernel(x_ref, s_ref, b_ref, o_ref):
    o_ref[...] = jnp.maximum(x_ref[...] * s_ref[...] + b_ref[...], 0.0)


def _affine_res_relu_kernel(x_ref, s_ref, b_ref, r_ref, o_ref):
    o_ref[...] = jnp.maximum(
        x_ref[...] * s_ref[...] + b_ref[...] + r_ref[...], 0.0)


@functools.partial(jax.jit, static_argnames=("relu", "tm"))
def _bn_act_call(x_p, s, b, r_p, relu, tm):
    Mp, C = x_p.shape
    x_spec = pl.BlockSpec((tm, C), lambda i: (i, 0))
    v_spec = pl.BlockSpec((1, C), lambda i: (0, 0))
    if r_p is not None:
        kernel = _affine_res_relu_kernel   # residual path always ends with ReLU
        in_specs = [x_spec, v_spec, v_spec, x_spec]
        args = (x_p, s, b, r_p)
    else:
        kernel = _affine_relu_kernel if relu else _affine_kernel
        in_specs = [x_spec, v_spec, v_spec]
        args = (x_p, s, b)
    return pl.pallas_call(
        kernel,
        out_shape=jax.ShapeDtypeStruct((Mp, C), jnp.float32),
        grid_spec=pltpu.PrefetchScalarGridSpec(
            num_scalar_prefetch=0,
            grid=(Mp // tm,),
            in_specs=in_specs,
            out_specs=x_spec),
        compiler_params=pltpu.CompilerParams(
            dimension_semantics=("parallel",),
            vmem_limit_bytes=32 * 1024 * 1024),
    )(*args)


def pallas_bn_act(x2d, scale, bias, residual=None, relu=True):
    M, C = x2d.shape
    scale = scale.reshape(1, C).astype(jnp.float32)
    bias = bias.reshape(1, C).astype(jnp.float32)

    # Lane-dense packing: C=64 -> view as 128 lanes so stores are full-width.
    pack = 128 // C if (C < 128 and 128 % C == 0) else 1
    Cp = C * pack
    if pack > 1:
        scale = jnp.tile(scale, (1, pack))
        bias = jnp.tile(bias, (1, pack))

    Mq = -(-M // pack)                               # packed rows (ceil)
    # Row tile targets ~512 KiB f32 slabs (fits comfortably in v7x's 64 MiB VMEM
    # even on the double-buffered residual path).
    tm = max(8, min(2048, (512 * 1024) // (Cp * 4)))
    tm = min(tm, _round_up(Mq, 8))
    tm = _round_up(tm, 8)
    Mq_p = _round_up(Mq, tm)
    Mp = Mq_p * pack

    def prep(t):
        t = t.astype(jnp.float32)
        if Mp > M:
            t = jnp.pad(t, ((0, Mp - M), (0, 0)))
        return t.reshape(Mq_p, Cp)

    x_p = prep(x2d)
    r_p = None if residual is None else prep(residual)
    out = _bn_act_call(x_p, scale, bias, r_p, relu, tm)
    return out.reshape(Mp, C)[:M]


def bn_apply(y2d, colsum, colssq, n_rows, gamma, beta, residual=None, relu=True,
             eps=1e-5):
    """Training-mode BatchNorm using fused matmul statistics."""
    mean = colsum / n_rows
    var = jnp.maximum(colssq / n_rows - mean * mean, 0.0)   # biased var, clamp cancellation
    scale = gamma.astype(jnp.float32) / jnp.sqrt(var + eps)
    bias = beta.astype(jnp.float32) - mean * scale
    return pallas_bn_act(y2d, scale, bias, residual=residual, relu=relu)


# ----------------------------------------------------------------------------
# Convolutions (bf16 im2col glue + Pallas matmul with fused BN stats)
# ----------------------------------------------------------------------------
def conv3x3(x, w, stride):
    """x: (B,H,W,Cin) NHWC; w: (Cout,Cin,3,3) PyTorch layout; pad=1, no bias."""
    B, H, W, Cin = x.shape
    Cout = w.shape[0]
    xp = jnp.pad(x.astype(jnp.bfloat16), ((0, 0), (1, 1), (1, 1), (0, 0)))
    Ho = (H + 2 - 3) // stride + 1
    Wo = (W + 2 - 3) // stride + 1
    cols = []
    for di in range(3):
        for dj in range(3):
            cols.append(xp[:, di:di + (Ho - 1) * stride + 1:stride,
                           dj:dj + (Wo - 1) * stride + 1:stride, :])
    patches = jnp.concatenate(cols, axis=-1).reshape(B * Ho * Wo, 9 * Cin)
    w2 = jnp.transpose(w, (2, 3, 1, 0)).reshape(9 * Cin, Cout).astype(jnp.bfloat16)
    out, colsum, colssq = pallas_matmul(patches, w2, with_stats=True)
    return out.reshape(B, Ho, Wo, Cout), colsum, colssq


def conv1x1(x, w, stride):
    """1x1 conv, pad=0, no bias (downsample shortcut)."""
    B, H, W, Cin = x.shape
    Cout = w.shape[0]
    xs = x[:, ::stride, ::stride, :].astype(jnp.bfloat16)
    Ho, Wo = xs.shape[1], xs.shape[2]
    w2 = jnp.transpose(w, (2, 3, 1, 0)).reshape(Cin, Cout).astype(jnp.bfloat16)
    out, colsum, colssq = pallas_matmul(xs.reshape(B * Ho * Wo, Cin), w2,
                                        with_stats=True)
    return out.reshape(B, Ho, Wo, Cout), colsum, colssq


# ----------------------------------------------------------------------------
# BasicBlock + full ResNet forward
# ----------------------------------------------------------------------------
def basic_block(x, p):
    stride = p['stride']

    h1, s1, q1 = conv3x3(x, p['conv1_w'], stride)
    B, Ho, Wo, C = h1.shape
    M = B * Ho * Wo
    h1 = bn_apply(h1.reshape(M, C), s1, q1, M,
                  p['bn1_g'], p['bn1_b'], relu=True).reshape(B, Ho, Wo, C)

    h2, s2, q2 = conv3x3(h1, p['conv2_w'], 1)

    if 'sc_conv_w' in p:
        sc, ss, qs = conv1x1(x, p['sc_conv_w'], stride)
        scf = bn_apply(sc.reshape(M, C), ss, qs, M,
                       p['sc_bn_g'], p['sc_bn_b'], relu=False)
    else:
        scf = x.reshape(M, C)

    out = bn_apply(h2.reshape(M, C), s2, q2, M,
                   p['bn2_g'], p['bn2_b'], residual=scf, relu=True)
    return out.reshape(B, Ho, Wo, C)


def resnet_forward(params, x_nchw):
    x = jnp.transpose(x_nchw, (0, 2, 3, 1)).astype(jnp.float32)  # NCHW -> NHWC
    batch_size = x.shape[0]

    h, cs, cq = conv3x3(x, params['conv1_w'], 1)
    B, H, W, C = h.shape
    M = B * H * W
    h = bn_apply(h.reshape(M, C), cs, cq, M, params['bn1_g'], params['bn1_b'],
                 relu=True).reshape(B, H, W, C)

    for blocks in params['layers']:
        for bp in blocks:
            h = basic_block(h, bp)

    # F.avg_pool2d(out, 4): 4x4 non-overlapping mean (tiny reduction, JAX glue).
    B, H, W, C = h.shape
    h = h.reshape(B, H // 4, 4, W // 4, 4, C).mean(axis=(2, 4))

    # Flatten in PyTorch NCHW order to match out.view(B, -1) on an NCHW tensor.
    h = jnp.transpose(h, (0, 3, 1, 2)).reshape(B, -1)

    logits = pallas_matmul(h, params['fc_w'].T) + params['fc_b'][None, :]
    return logits.reshape(batch_size, 2, 4, 5)


# ----------------------------------------------------------------------------
# Deterministic parameter initialization (shapes from the nn.Module __init__)
# ----------------------------------------------------------------------------
def _conv_init(key, cout, cin, kh, kw):
    fan_in = cin * kh * kw
    return (jax.random.normal(key, (cout, cin, kh, kw), jnp.float32)
            * jnp.sqrt(2.0 / fan_in))


def init_params(key, num_of_img, num_blocks, spatial_hw):
    keys = iter(jax.random.split(key, 256))
    params = {
        'conv1_w': _conv_init(next(keys), 64, num_of_img, 3, 3),
        'bn1_g': jnp.ones((64,), jnp.float32),
        'bn1_b': jnp.zeros((64,), jnp.float32),
    }
    in_planes = 64
    layers = []
    for planes, nb, stride0 in zip([64, 128, 256, 512], num_blocks, [1, 2, 2, 2]):
        blocks = []
        strides = [stride0] + [1] * (nb - 1)
        for s in strides:
            bp = {
                'stride': s,
                'conv1_w': _conv_init(next(keys), planes, in_planes, 3, 3),
                'bn1_g': jnp.ones((planes,), jnp.float32),
                'bn1_b': jnp.zeros((planes,), jnp.float32),
                'conv2_w': _conv_init(next(keys), planes, planes, 3, 3),
                'bn2_g': jnp.ones((planes,), jnp.float32),
                'bn2_b': jnp.zeros((planes,), jnp.float32),
            }
            if s != 1 or in_planes != planes:
                bp['sc_conv_w'] = _conv_init(next(keys), planes, in_planes, 1, 1)
                bp['sc_bn_g'] = jnp.ones((planes,), jnp.float32)
                bp['sc_bn_b'] = jnp.zeros((planes,), jnp.float32)
            blocks.append(bp)
            in_planes = planes
        layers.append(blocks)
    params['layers'] = layers

    Hin, Win = spatial_hw
    fc_in = 512 * (Hin // 32) * (Win // 32)     # 39424 for the original 224x352 input
    num_classes = 4 * 5 * 2
    params['fc_w'] = (jax.random.normal(next(keys), (num_classes, fc_in), jnp.float32)
                      / jnp.sqrt(float(fc_in)))
    params['fc_b'] = jnp.zeros((num_classes,), jnp.float32)
    return params


if __name__ == "__main__":
    key = jax.random.PRNGKey(0)
    k_x, k_p = jax.random.split(key)

    num_of_img = 4                 # in_channels for conv1 (module arg)
    num_blocks = [1, 1, 1, 1]      # smallest block config consistent with the module
    H = W = 32                     # small test spatial (final feature map 4x4 -> pool 1x1)
    x = jax.random.normal(k_x, (2, num_of_img, H, W), jnp.float32)

    params = init_params(k_p, num_of_img, num_blocks, (H, W))
    out = resnet_forward(params, x)
    out = jax.block_until_ready(out)
    assert out.shape == (2, 2, 4, 5)
    assert bool(jnp.all(jnp.isfinite(out)))
    print("KERNEL_OK")
</pallas_src>

<mosaic_0001>
module attributes {stable_mosaic.version = 11 : i64} {
  func.func @_mm_stats_kernel(%arg0: i32, %arg1: i32, %arg2: i32, %arg3: memref<256x128xbf16, #tpu.memory_space<vmem>>, %arg4: memref<128x128xbf16, #tpu.memory_space<vmem>>, %arg5: memref<256x128xf32, #tpu.memory_space<vmem>>, %arg6: memref<8x128xf32, #tpu.memory_space<vmem>>, %arg7: memref<256x128xf32, #tpu.memory_space<vmem>>) attributes {dimension_semantics = [#tpu.dimension_semantics<parallel>, #tpu.dimension_semantics<parallel>, #tpu.dimension_semantics<arbitrary>], iteration_bounds = array<i64: 8, 1, 1>, scalar_prefetch = 0 : i64, scratch_operands = 1 : i64, tpu.core_type = #tpu.core_type<tc>, window_params = [{transform_indices = @transform_0, window_bounds = array<i64: 256, 128>}, {transform_indices = @transform_1, window_bounds = array<i64: 128, 128>}, {transform_indices = @transform_2, window_bounds = array<i64: 256, 128>}, {transform_indices = @transform_3, window_bounds = array<i64: 8, 128>}]} {
    %c0_i32 = arith.constant 0 : i32
    %0 = arith.cmpi eq, %arg2, %c0_i32 : i32
    %1 = arith.extui %0 : i1 to i32
    %c0_i32_0 = arith.constant 0 : i32
    %2 = arith.cmpi ne, %1, %c0_i32_0 : i32
    scf.if %2 {
      %cst_10 = arith.constant 0.000000e+00 : f32
      %12 = vector.broadcast %cst_10 : f32 to vector<256x128xf32>
      %c0_11 = arith.constant 0 : index
      %c0_12 = arith.constant 0 : index
      %13 = vector.load %arg7[%c0_11, %c0_12] : memref<256x128xf32, #tpu.memory_space<vmem>>, vector<256x128xf32>
      tpu.vector_store %arg7[%c0_11, %c0_12], %12 {strides = array<i32>} : memref<256x128xf32, #tpu.memory_space<vmem>>, vector<256x128xf32>,
    } else {
    }
    %c0 = arith.constant 0 : index
    %c0_1 = arith.constant 0 : index
    %3 = vector.load %arg7[%c0, %c0_1] : memref<256x128xf32, #tpu.memory_space<vmem>>, vector<256x128xf32>
    %c0_2 = arith.constant 0 : index
    %c0_3 = arith.constant 0 : index
    %4 = vector.load %arg3[%c0_2, %c0_3] : memref<256x128xbf16, #tpu.memory_space<vmem>>, vector<256x128xbf16>
    %c0_4 = arith.constant 0 : index
    %c0_5 = arith.constant 0 : index
    %5 = vector.load %arg4[%c0_4, %c0_5] : memref<128x128xbf16, #tpu.memory_space<vmem>>, vector<128x128xbf16>
    %cst = arith.constant dense<0.000000e+00> : vector<256x128xf32>
    %6 = tpu.matmul %4, %5, %cst {dimension_numbers = #tpu.dot_dimension_numbers<[1], [0], [0], [1], [0, 0, 1, 1], [], []>} : vector<256x128xbf16>, vector<128x128xbf16>, vector<256x128xf32> -> vector<256x128xf32>
    %7 = arith.addf %3, %6 : vector<256x128xf32>
    %c0_6 = arith.constant 0 : index
    %c0_7 = arith.constant 0 : index
    %8 = vector.load %arg7[%c0_6, %c0_7] : memref<256x128xf32, #tpu.memory_space<vmem>>, vector<256x128xf32>
    tpu.vector_store %arg7[%c0_6, %c0_7], %7 {strides = array<i32>} : memref<256x128xf32, #tpu.memory_space<vmem>>, vector<256x128xf32>,
    %c0_i32_8 = arith.constant 0 : i32
    %9 = arith.cmpi eq, %arg2, %c0_i32_8 : i32
    %10 = arith.extui %9 : i1 to i32
    %c0_i32_9 = arith.constant 0 : i32
    %11 = arith.cmpi ne, %10, %c0_i32_9 : i32
    scf.if %11 {
      %c0_10 = arith.constant 0 : index
      %c0_11 = arith.constant 0 : index
      %12 = vector.load %arg7[%c0_10, %c0_11] : memref<256x128xf32, #tpu.memory_space<vmem>>, vector<256x128xf32>
      %c0_12 = arith.constant 0 : index
      %c0_13 = arith.constant 0 : index
      %13 = vector.load %arg5[%c0_12, %c0_13] : memref<256x128xf32, #tpu.memory_space<vmem>>, vector<256x128xf32>
      tpu.vector_store %arg5[%c0_12, %c0_13], %12 {strides = array<i32>} : memref<256x128xf32, #tpu.memory_space<vmem>>, vector<256x128xf32>,
      %cst_14 = arith.constant dense<0.000000e+00> : vector<128xf32>
      %14 = vector.multi_reduction <add>, %12, %cst_14 [0] : vector<256x128xf32> to vector<128xf32>
      %15 = vector.shape_cast %14 : vector<128xf32> to vector<1x128xf32>
      %16 = arith.mulf %12, %12 : vector<256x128xf32>
      %cst_15 = arith.constant dense<0.000000e+00> : vector<128xf32>
      %17 = vector.multi_reduction <add>, %16, %cst_15 [0] : vector<256x128xf32> to vector<128xf32>
      %18 = vector.shape_cast %17 : vector<128xf32> to vector<1x128xf32>
      %19 = tpu.iota {dimensions = array<i32: 0>} : vector<8x128xi32>
      %c0_i32_16 = arith.constant 0 : i32
      %20 = vector.broadcast %c0_i32_16 : i32 to vector<8x128xi32>
      %21 = arith.cmpi eq, %19, %20 : vector<8x128xi32>
      %c1_i32 = arith.constant 1 : i32
      %22 = vector.broadcast %c1_i32 : i32 to vector<8x128xi32>
      %23 = arith.cmpi eq, %19, %22 : vector<8x128xi32>
      %cst_17 = arith.constant 0.000000e+00 : f32
      %24 = vector.shape_cast %18 : vector<1x128xf32> to vector<1x128xf32>
      %25 = vector.broadcast %24 : vector<1x128xf32> to vector<8x128xf32>
      %26 = vector.broadcast %cst_17 : f32 to vector<8x128xf32>
      %27 = arith.select %23, %25, %26 : vector<8x128xi1>, vector<8x128xf32>
      %28 = vector.shape_cast %15 : vector<1x128xf32> to vector<1x128xf32>
      %29 = vector.broadcast %28 : vector<1x128xf32> to vector<8x128xf32>
      %30 = arith.select %21, %29, %27 : vector<8x128xi1>, vector<8x128xf32>
      %c0_18 = arith.constant 0 : index
      %c0_19 = arith.constant 0 : index
      %31 = vector.load %arg6[%c0_18, %c0_19] : memref<8x128xf32, #tpu.memory_space<vmem>>, vector<8x128xf32>
      tpu.vector_store %arg6[%c0_18, %c0_19], %30 {strides = array<i32>} : memref<8x128xf32, #tpu.memory_space<vmem>>, vector<8x128xf32>,
    } else {
    }
    return
  }
  func.func @transform_0(%arg0: i32, %arg1: i32, %arg2: i32) -> (i32, i32) {
    %c0_i32 = arith.constant 0 : i32
    return %arg0, %arg2 : i32, i32
  }
  func.func @transform_1(%arg0: i32, %arg1: i32, %arg2: i32) -> (i32, i32) {
    %c0_i32 = arith.constant 0 : i32
    return %arg2, %arg1 : i32, i32
  }
  func.func @transform_2(%arg0: i32, %arg1: i32, %arg2: i32) -> (i32, i32) {
    %c0_i32 = arith.constant 0 : i32
    return %arg0, %arg1 : i32, i32
  }
  func.func @transform_3(%arg0: i32, %arg1: i32, %arg2: i32) -> (i32, i32) {
    %c0_i32 = arith.constant 0 : i32
    return %arg0, %arg1 : i32, i32
  }
}

</mosaic_0001>

<bundles_post_ra>
// kernel: _mm_call.1
= control target key start
LH: loop header
LB: loop body
LE: loop exit
PB: predicated region body
PF: predicated region fallthrough
CT: control target
= control target key end

     0   :  { %9 = vsyncpa [#allocation4], 0  ;;  %s1887_s0 = inlined_call_operand.hbm [shape: bf16[2048,128], index: 0, kind: input, shape index: {}]   ;;  %s1888_s1 = inlined_call_operand.hbm [shape: bf16[128,128], index: 1, kind: input, shape index: {}]   ;;  %s1889_s2 = inlined_call_operand.hbm [shape: f32[2048,128], index: 2, kind: output, shape index: {0}]   ;;  %s1890_s3 = inlined_call_operand.hbm [shape: f32[64,128], index: 3, kind: output, shape index: {1}]  }
   0x1   :  { %11 = vsyncpa [#allocation4 + $0x1], 0 }
   0x2   :  { %12 = vsyncpa [#allocation7], 0 }
   0x3   :  { %13 = vsyncpa [#allocation5], 0 }
   0x4   :  { %15 = vsyncpa [#allocation5 + $0x1], 0 }
   0x5   :  { %16 = vsyncpa [#allocation10], 0 }
   0x6   :  { %18 = vsyncpa [#allocation10 + $0x1], 0  ;;  %s1528_s12 = smov 0   ;;  %s1530_s13 = smov 0  }
   0x7   :  { %s1532_s14 = smov 0   ;;  %s1534_s15 = smov 0  }
   0x8   :  { %s1536_s16 = smov 0   ;;  %s1538_s17 = smov 0  }
   0x9 LB: > { %s1090_s18 = sadd.s32 4294967295, %s1498_s17   ;;  %s1091_s19 = sadd.s32 4294967294, %s1498_s17   ;;  %s1498_s17 = sphi %s1538_s17, %s24_s17   ;;  %s1494_s16 = sphi %s1536_s16, %s1911_s16   ;;  %s1490_s15 = sphi %s1534_s15, %s1910_s15   ;;  %s1486_s14 = sphi %s1532_s14, %s1909_s14   ;;  %s1482_s13 = sphi %s1530_s13, %s1908_s13   ;;  %s1478_s12 = sphi %s1528_s12, %s1907_s12  }
   0xa   : > { %p65_p0 = scmp.ne.s32.totalorder %s1482_s13, %s1478_s12  ;;  %p1562_p1 = scmp.eq.s32.totalorder %s1090_s18, 0 }
   0xb   : > { %p1566_p2 = scmp.eq.s32.totalorder %s1090_s18, 7  ;;  %p125_p3 = scmp.eq.s32.totalorder %s1091_s19, 7 }
   0xc   : > { %p1572_p4 = por %p1562_p1, %p65_p0  ;;  %p1092_p5 = scmp.ge.s32.totalorder %s1498_s17, 1 }
   0xd   : > { %p1577_p6 = por %p125_p3, %p65_p0  ;;  %p160_p7 = scmp.lt.s32.totalorder %s1498_s17, 9 }
   0xe   : > { %s1500_s25 = smov [#allocation6]   ;;  %s43_s28 = sadd.s32 1, %s1494_s16 }
   0xf   : > { %s1897_s23 = scalar_select %p1577_p6, 1, 0 }
  0x10   : > { %p1582_p8 = pnand %p1092_p5, %p160_p7  ;;  %s176_s26 = sshll.u32 %s1500_s25, 4  ;;  %s177_s26 = int_to_ptr.vmem [resolvable:$true] %s176_s26 }
  0x11   : > { %s1341_s29 = scalar_lea.vmem %s177_s26, 1024  ;;  %p1349_p3 = scmp.lt.s32.totalorder %s177_s26, %s177_s26 }
  0x12   : > { %p1234_p9 = pneg %p1582_p8  ;;  %p1342_p12 = scmp.ne.s32.totalorder %s177_s26, %s1341_s29 }
  0x13   : > { %p1350_p5 = scmp.lt.s32.totalorder %s1341_s29, %s1341_s29 }
  0x14   : > { %p1590_p10 = pnand %p1234_p9, %p1562_p1 }
  0x15   : > { %p1351_p7 = por %p1350_p5, %p1349_p3 }
  0x16   : > { %p1332_p11 = pneg %p1590_p10 }
  0x18   : > { %p1344_p13 = pnand %p1342_p12, %p1332_p11 }
  0x1a   : > { %p1345_p0 = pneg %p1344_p13 }
  0x1c   : > { %p1352_p6 = pnand %p1351_p7, %p1345_p0 }
  0x1e   : > { %1355 = shalt.err (!%p1352_p6)
}
  0x1f   : > { %s1891_s30 = smov 64   ;;  %s1892_s4 = smov 4  }
  0x20   : > { %1237 = dma.hbm_to_vmem [thread:$0]  (!%p1590_p10), %s1888_s1, 1024, %s177_s26, [#allocation7], %s1891_s30, %s1891_s30, %s1892_s4  }
  0x21   : > { %p45_p6 = scmp.ge.s32.totalorder %s43_s28, 8  ;;  %s52_s7 = sadd.s32 1, %s1486_s14 }
  0x22   : > { %p59_p9 = scmp.ne.s32.totalorder %s1486_s14, %s1482_s13  ;;  %p60_p11 = scmp.eq.s32.totalorder %s1498_s17, 0 }
  0x23   : > { %s1913_s28 = smov (%p45_p6, %s43_s28), 0  ;;  %p1250_p0 = scmp.lt.s32.totalorder %s1498_s17, 8 }
  0x24   : > { %p1611_p12 = por %p60_p11, %p59_p9  ;;  %p1617_p13 = por %p1566_p2, %p59_p9 }
  0x25   : > { %s47_s10 = ssub.s32 %s1494_s16, %s1913_s28  ;;  %s190_s11 = sand.u32 1, %s1486_s14  }
  0x26   : > { %s1901_s9 = scalar_select %p1617_p13, 1, 0 }
  0x27   : > { %p50_p10 = scmp.eq.s32.totalorder %s47_s10, 0  ;;  %s1095_s18 = sshll.u32 %s190_s11, 7 }
  0x28   : > { %s1134_s25 = sshll.u32 %s1494_s16, 11  ;;  %s194_s5 = scalar_lea.vmem [#allocation3], %s1095_s18 }
  0x29   : > { %s1626_s19 = scalar_select %p50_p10, %s1486_s14, %s52_s7  }
  0x2a   : > { %s201_s29 = scalar_lea.hbm %s1887_s0, %s1134_s25  ;;  %s202_s6 = sshll.u32 %s194_s5, 4  ;;  %s203_s6 = int_to_ptr.vmem [resolvable:$true] %s202_s6 }
  0x2b   : > { %p1634_p2 = pnand %p1250_p0, %p1611_p12  ;;  %s191_s30 = scalar_lea.sflag [#allocation4], %s190_s11 }
  0x2c   : > { %s1369_s10 = scalar_lea.vmem %s203_s6, 2048  ;;  %s1503_s7 = smov [#allocation3]  }
  0x2d   : > { %p1358_p3 = pneg %p1634_p2  ;;  %p1370_p5 = scmp.ne.s32.totalorder %s203_s6, %s1369_s10 }
  0x2e   : > { %s1374_s4 = sshll.u32 %s1503_s7, 4  ;;  %s1375_s4 = int_to_ptr.vmem [resolvable:$false] %s1374_s4 }
  0x2f   : > { %p1372_p7 = pnand %p1370_p5, %p1358_p3  ;;  %s1376_s25 = scalar_lea.vmem %s1375_s4, 4096 }
  0x30   : > { %p1377_p9 = scmp.lt.s32.totalorder %s203_s6, %s1375_s4  ;;  %p1378_p11 = scmp.lt.s32.totalorder %s1376_s25, %s1369_s10 }
  0x31   : > { %p1373_p6 = pneg %p1372_p7 }
  0x32   : > { %p1379_p10 = por %p1378_p11, %p1377_p9 }
  0x34   : > { %p1380_p13 = pnand %p1379_p10, %p1373_p6 }
  0x36   : > { %1383 = shalt.err (!%p1380_p13)
}
  0x37   : > { %s1903_s8 = smov 4   ;;  %s1904_s18 = smov 64  }
  0x38   : > { %1241 = dma.hbm_to_vmem [thread:$0]  (!%p1634_p2), %s201_s29, 2048, %s203_s6, %s191_s30, %s1904_s18, %s1904_s18, %s1903_s8  }
  0x39   : > { %214 = sbr.rel (%p1582_p8) target bundleno = 398 (0x18e), region = 28  ;;  %s1648_s11 = sand.u32 (!%p1582_p8), 1, %s1482_s13  }
  0x3a   : > { %s1099_s4 = sshll.u32 (!%p1582_p8), %s1648_s11, 7  ;;  %s217_s26 = scalar_lea.sflag (!%p1582_p8), [#allocation4], %s1648_s11 }
  0x3b   : > { %s1652_s27 = scalar_lea.vmem (!%p1582_p8), [#allocation3], %s1099_s4 }
  0x3e   : > { %1461 = dma.done.wait (%p1572_p4), %s217_s26, 2048  }
  0x3f   : > { %1463 = vsyncadd (%p1572_p4), %s217_s26, 4294965248 }
  0x40   : > { %1465 = dma.done.wait (%p1562_p1), [#allocation7], 1024  }
  0x41   : > { %1467 = vsyncadd (%p1562_p1), [#allocation7], 4294966272  ;;  %v1306_v0 = vld [vmem:[#allocation6 + $0x38] sm:$0xff]   ;;  %v1307_v1 = vld [vmem:[#allocation6 + $0x30] sm:$0xff]   ;;  %s1101_s20 = sshll.u32 %s1648_s11, 8  ;;  %s1135_s24 = sshll.u32 %s1490_s15, 12 }
  0x42   : > { %1160 = vmatprep.subr.bf16.mxu0 %v1306_v0  ;;  %1208 = vmatprep.subr.bf16.mxu1 %v1306_v0  ;;  %v1308_v2 = vld [vmem:[#allocation6 + $0x28] sm:$0xff]   ;;  %v1309_v3 = vld [vmem:[#allocation6 + $0x20] sm:$0xff]   ;;  %v1310_v5 = vld [vmem:[#allocation6 + $0x18] sm:$0xff]   ;;  %s1681_s22 = scalar_lea.vmem [#allocation8], %s1101_s20  ;;  %s1758_s6 = scalar_lea.hbm %s1889_s2, %s1135_s24 }
  0x43   : > { %1161 = vmatpush3.bf16.msra.mxu0 %v1306_v0  ;;  %1216 = vmatpush3.bf16.msra.mxu1 %v1306_v0  ;;  %v1314_v4 = vld [vmem:[%s1652_s27] sm:$0xff]   ;;  %v1311_v6 = vld [vmem:[#allocation6 + $0x10] sm:$0xff]   ;;  %v1312_v8 = vld [vmem:[#allocation6 + $0x8] sm:$0xff]   ;;  %s941_s30 = sshll.u32 %s1681_s22, 4  ;;  %s922_s21 = scalar_lea.sflag [#allocation5], %s1648_s11  ;;  %s1760_s30 = int_to_ptr.vmem [resolvable:$true] %s941_s30 }
  0x44   : > { %1162 = vmatprep.subr.bf16.mxu0 %v1307_v1  ;;  %1209 = vmatprep.subr.bf16.mxu1 %v1307_v1  ;;  %v1322_v7 = vld [vmem:[%s1652_s27 + $0x40] sm:$0xff]   ;;  %v1315_v10 = vld [vmem:[%s1652_s27 + $0x8] sm:$0xff]   ;;  %v1316_v12 = vld [vmem:[%s1652_s27 + $0x10] sm:$0xff]   ;;  %s1384_s10 = scalar_lea.vmem %s1760_s30, 4096  ;;  %p1905_p4 = scmp.ne.s32.totalorder %s1901_s9, 0 }
  0x45   : > { %1176 = vmatprep.mubr.bf16.mxu0 %v1314_v4  ;;  %1192 = vmatprep.mubr.bf16.mxu1 %v1322_v7  ;;  %v1313_v9 = vld [vmem:[#allocation6] sm:$0xff]   ;;  %v1323_v11 = vld [vmem:[%s1652_s27 + $0x48] sm:$0xff]   ;;  %v1324_v13 = vld [vmem:[%s1652_s27 + $0x50] sm:$0xff]   ;;  %p1385_p1 = scmp.ne.s32.totalorder %s1760_s30, %s1384_s10  ;;  %s1504_s7 = smov [#allocation8]  }
  0x46   : > { %v1317_v14 = vld [vmem:[%s1652_s27 + $0x18] sm:$0xff]   ;;  %v1318_v16 = vld [vmem:[%s1652_s27 + $0x20] sm:$0xff]   ;;  %v1319_v18 = vld [vmem:[%s1652_s27 + $0x28] sm:$0xff]   ;;  %s1388_s25 = sshll.u32 %s1504_s7, 4  ;;  %s1389_s25 = int_to_ptr.vmem [resolvable:$false] %s1388_s25 }
  0x47   : > { %1163 = vmatpush3.bf16.msra.mxu0 %v1307_v1  ;;  %1217 = vmatpush3.bf16.msra.mxu1 %v1307_v1  ;;  %v1325_v15 = vld [vmem:[%s1652_s27 + $0x58] sm:$0xff]   ;;  %v1326_v17 = vld [vmem:[%s1652_s27 + $0x60] sm:$0xff]   ;;  %v1327_v19 = vld [vmem:[%s1652_s27 + $0x68] sm:$0xff]   ;;  %p1386_p8 = pnand %p1385_p1, %p1905_p4  ;;  %s1390_s8 = scalar_lea.vmem %s1389_s25, 8192 }
  0x48   : > { %1164 = vmatprep.subr.bf16.mxu0 %v1308_v2  ;;  %1210 = vmatprep.subr.bf16.mxu1 %v1308_v2  ;;  %v1320_v20 = vld [vmem:[%s1652_s27 + $0x30] sm:$0xff]   ;;  %v1321_v22 = vld [vmem:[%s1652_s27 + $0x38] sm:$0xff]   ;;  %p1391_p13 = scmp.lt.s32.totalorder %s1760_s30, %s1389_s25  ;;  %p1392_p0 = scmp.lt.s32.totalorder %s1390_s8, %s1384_s10 }
  0x49   : > { %v1328_v21 = vld [vmem:[%s1652_s27 + $0x70] sm:$0xff]   ;;  %v1329_v23 = vld [vmem:[%s1652_s27 + $0x78] sm:$0xff]   ;;  %p1387_p12 = pneg %p1386_p8 }
  0x4a   : > { %p1393_p2 = por %p1392_p0, %p1391_p13 }
  0x4b   : > { %1165 = vmatpush3.bf16.msra.mxu0 %v1308_v2  ;;  %1218 = vmatpush3.bf16.msra.mxu1 %v1308_v2 }
  0x4c   : > { %1166 = vmatprep.subr.bf16.mxu0 %v1309_v3  ;;  %1211 = vmatprep.subr.bf16.mxu1 %v1309_v3  ;;  %p1394_p3 = pnand %p1393_p2, %p1387_p12 }
  0x4f   : > { %1167 = vmatpush3.bf16.msra.mxu0 %v1309_v3  ;;  %1219 = vmatpush3.bf16.msra.mxu1 %v1309_v3 }
  0x50   : > { %1168 = vmatprep.subr.bf16.mxu0 %v1310_v5  ;;  %1212 = vmatprep.subr.bf16.mxu1 %v1310_v5 }
  0x53   : > { %1169 = vmatpush3.bf16.msra.mxu0 %v1310_v5  ;;  %1220 = vmatpush3.bf16.msra.mxu1 %v1310_v5 }
  0x54   : > { %1170 = vmatprep.subr.bf16.mxu0 %v1311_v6  ;;  %1213 = vmatprep.subr.bf16.mxu1 %v1311_v6 }
  0x57   : > { %1171 = vmatpush3.bf16.msra.mxu0 %v1311_v6  ;;  %1221 = vmatpush3.bf16.msra.mxu1 %v1311_v6 }
  0x58   : > { %1172 = vmatprep.subr.bf16.mxu0 %v1312_v8  ;;  %1214 = vmatprep.subr.bf16.mxu1 %v1312_v8 }
  0x5b   : > { %1173 = vmatpush3.bf16.msra.mxu0 %v1312_v8  ;;  %1222 = vmatpush3.bf16.msra.mxu1 %v1312_v8 }
  0x5c   : > { %1174 = vmatprep.subr.bf16.mxu0 %v1313_v9  ;;  %1215 = vmatprep.subr.bf16.mxu1 %v1313_v9 }
  0x5f   : > { %1175 = vmatpush3.bf16.msra.mxu0 %v1313_v9  ;;  %1223 = vmatpush3.bf16.msra.mxu1 %v1313_v9 }
  0x62   : > { %1177 = vmatmul.mubr.bf16.vlgmr.msra.gmra.mxu0 %v1315_v10  ;;  %1193 = vmatmul.mubr.bf16.vlgmr.msra.gmra.mxu1 %v1323_v11 }
  0x63   : > { %1180 = vmatprep.mubr.bf16.mxu0 %v1316_v12  ;;  %1196 = vmatprep.mubr.bf16.mxu1 %v1324_v13 }
  0x6a   : > { %1181 = vmatmul.mubr.bf16.gmra.mxu0 %v1317_v14  ;;  %1197 = vmatmul.mubr.bf16.gmra.mxu1 %v1325_v15 }
  0x6b   : > { %1184 = vmatprep.mubr.bf16.mxu0 %v1318_v16  ;;  %1200 = vmatprep.mubr.bf16.mxu1 %v1326_v17 }
  0x72   : > { %1185 = vmatmul.mubr.bf16.gmra.mxu0 %v1319_v18  ;;  %1201 = vmatmul.mubr.bf16.gmra.mxu1 %v1327_v19 }
  0x73   : > { %1188 = vmatprep.mubr.bf16.mxu0 %v1320_v20  ;;  %1204 = vmatprep.mubr.bf16.mxu1 %v1328_v21 }
  0x7a   : > { %1189 = vmatmul.mubr.bf16.gmra.mxu0 %v1321_v22  ;;  %1205 = vmatmul.mubr.bf16.gmra.mxu1 %v1329_v23 }
 0x122   : > { %v1178_v24 = vpop.f32.mrf.mxu0  ;;  %v1679_v25 = vpop.f32.mrf.mxu1 }
 0x123   : > { %778 = vst [vmem:[%s1681_s22 + $0x10] sm:$0xff] %v1178_v24  ;;  %794 = vst [vmem:[%s1681_s22 + $0x90] sm:$0xff] %v1679_v25  ;;  %v847_v37 = vmul.f32 %v1178_v24, %v1178_v24 }
 0x124   : > { %v550_v26 = vpop.f32.mrf.mxu0  ;;  %v1686_v27 = vpop.f32.mrf.mxu1 }
 0x125   : > { %776 = vst [vmem:[%s1681_s22] sm:$0xff] %v550_v26  ;;  %792 = vst [vmem:[%s1681_s22 + $0x80] sm:$0xff] %v1686_v27  ;;  %v845_v32 = vmul.f32 %v550_v26, %v550_v26 }
 0x126   : > { %v1179_v28 = vpop.f32.mrf.mxu0  ;;  %v1691_v29 = vpop.f32.mrf.mxu1 }
 0x127   : > { %779 = vst [vmem:[%s1681_s22 + $0x18] sm:$0xff] %v1179_v28  ;;  %795 = vst [vmem:[%s1681_s22 + $0x98] sm:$0xff] %v1691_v29  ;;  %v848_v42 = vmul.f32 %v1179_v28, %v1179_v28 }
 0x128   : > { %v553_v30 = vpop.f32.mrf.mxu0  ;;  %v1696_v31 = vpop.f32.mrf.mxu1 }
 0x129   : > { %777 = vst [vmem:[%s1681_s22 + $0x8] sm:$0xff] %v553_v30  ;;  %v808_v33 = vadd.f32 %v553_v30, %v550_v26  ;;  %v846_v34 = vmul.f32 %v553_v30, %v553_v30  ;;  %793 = vst [vmem:[%s1681_s22 + $0x88] sm:$0xff] %v1696_v31 }
 0x12a   : > { %v1182_v35 = vpop.f32.mrf.mxu0  ;;  %v1701_v36 = vpop.f32.mrf.mxu1 }
 0x12b   : > { %v809_v38 = vadd.f32 %v1178_v24, %v808_v33  ;;  %v877_v39 = vadd.f32 %v846_v34, %v845_v32  ;;  %782 = vst [vmem:[%s1681_s22 + $0x30] sm:$0xff] %v1182_v35  ;;  %798 = vst [vmem:[%s1681_s22 + $0xb0] sm:$0xff] %v1701_v36  ;;  %v851_v57 = vmul.f32 %v1182_v35, %v1182_v35 }
 0x12c   : > { %v566_v40 = vpop.f32.mrf.mxu0  ;;  %v1706_v41 = vpop.f32.mrf.mxu1 }
 0x12d   : > { %v878_v43 = vadd.f32 %v877_v39, %v847_v37  ;;  %780 = vst [vmem:[%s1681_s22 + $0x20] sm:$0xff] %v566_v40  ;;  %v810_v44 = vadd.f32 %v1179_v28, %v809_v38  ;;  %796 = vst [vmem:[%s1681_s22 + $0xa0] sm:$0xff] %v1706_v41  ;;  %v849_v48 = vmul.f32 %v566_v40, %v566_v40 }
 0x12e   : > { %v1183_v45 = vpop.f32.mrf.mxu0  ;;  %v1711_v46 = vpop.f32.mrf.mxu1 }
 0x12f   : > { %v811_v47 = vadd.f32 %v810_v44, %v566_v40  ;;  %v879_v49 = vadd.f32 %v878_v43, %v848_v42  ;;  %783 = vst [vmem:[%s1681_s22 + $0x38] sm:$0xff] %v1183_v45  ;;  %799 = vst [vmem:[%s1681_s22 + $0xb8] sm:$0xff] %v1711_v46  ;;  %v852_v62 = vmul.f32 %v1183_v45, %v1183_v45 }
 0x130   : > { %v569_v50 = vpop.f32.mrf.mxu0  ;;  %v1716_v51 = vpop.f32.mrf.mxu1 }
 0x131   : > { %v880_v52 = vadd.f32 %v879_v49, %v849_v48  ;;  %781 = vst [vmem:[%s1681_s22 + $0x28] sm:$0xff] %v569_v50  ;;  %v812_v53 = vadd.f32 %v811_v47, %v569_v50  ;;  %v850_v54 = vmul.f32 %v569_v50, %v569_v50  ;;  %797 = vst [vmem:[%s1681_s22 + $0xa8] sm:$0xff] %v1716_v51 }
 0x132   : > { %v1186_v55 = vpop.f32.mrf.mxu0  ;;  %v1721_v56 = vpop.f32.mrf.mxu1 }
 0x133   : > { %v813_v58 = vadd.f32 %v1182_v35, %v812_v53  ;;  %v881_v59 = vadd.f32 %v880_v52, %v850_v54  ;;  %786 = vst [vmem:[%s1681_s22 + $0x50] sm:$0xff] %v1186_v55  ;;  %802 = vst [vmem:[%s1681_s22 + $0xd0] sm:$0xff] %v1721_v56  ;;  %v855_v13 = vmul.f32 %v1186_v55, %v1186_v55 }
 0x134   : > { %v582_v60 = vpop.f32.mrf.mxu0  ;;  %v1726_v61 = vpop.f32.mrf.mxu1 }
 0x135   : > { %v882_v63 = vadd.f32 %v881_v59, %v851_v57  ;;  %784 = vst [vmem:[%s1681_s22 + $0x40] sm:$0xff] %v582_v60  ;;  %v814_v0 = vadd.f32 %v1183_v45, %v813_v58  ;;  %800 = vst [vmem:[%s1681_s22 + $0xc0] sm:$0xff] %v1726_v61  ;;  %v853_v4 = vmul.f32 %v582_v60, %v582_v60 }
 0x136   : > { %v1187_v1 = vpop.f32.mrf.mxu0  ;;  %v1731_v2 = vpop.f32.mrf.mxu1 }
 0x137   : > { %v815_v3 = vadd.f32 %v814_v0, %v582_v60  ;;  %v883_v5 = vadd.f32 %v882_v63, %v852_v62  ;;  %787 = vst [vmem:[%s1681_s22 + $0x58] sm:$0xff] %v1187_v1  ;;  %803 = vst [vmem:[%s1681_s22 + $0xd8] sm:$0xff] %v1731_v2  ;;  %v856_v18 = vmul.f32 %v1187_v1, %v1187_v1 }
 0x138   : > { %v585_v6 = vpop.f32.mrf.mxu0  ;;  %v1736_v7 = vpop.f32.mrf.mxu1 }
 0x139   : > { %v884_v8 = vadd.f32 %v883_v5, %v853_v4  ;;  %785 = vst [vmem:[%s1681_s22 + $0x48] sm:$0xff] %v585_v6  ;;  %v816_v9 = vadd.f32 %v815_v3, %v585_v6  ;;  %v854_v10 = vmul.f32 %v585_v6, %v585_v6  ;;  %801 = vst [vmem:[%s1681_s22 + $0xc8] sm:$0xff] %v1736_v7 }
 0x13a   : > { %v1190_v11 = vpop.f32.mrf.mxu0  ;;  %v1741_v12 = vpop.f32.mrf.mxu1 }
 0x13b   : > { %v817_v14 = vadd.f32 %v1186_v55, %v816_v9  ;;  %v885_v15 = vadd.f32 %v884_v8, %v854_v10  ;;  %790 = vst [vmem:[%s1681_s22 + $0x70] sm:$0xff] %v1190_v11  ;;  %806 = vst [vmem:[%s1681_s22 + $0xf0] sm:$0xff] %v1741_v12 }
 0x13c   : > { %v598_v16 = vpop.f32.mrf.mxu0  ;;  %v1748_v17 = vpop.f32.mrf.mxu1 }
 0x13d   : > { %v886_v19 = vadd.f32 %v885_v15, %v855_v13  ;;  %788 = vst [vmem:[%s1681_s22 + $0x60] sm:$0xff] %v598_v16  ;;  %v818_v20 = vadd.f32 %v1187_v1, %v817_v14  ;;  %804 = vst [vmem:[%s1681_s22 + $0xe0] sm:$0xff] %v1748_v17  ;;  %v857_v24 = vmul.f32 %v598_v16, %v598_v16 }
 0x13e   : > { %v1191_v21 = vpop.f32.mrf.mxu0  ;;  %v1753_v22 = vpop.f32.mrf.mxu1 }
 0x13f   : > { %v819_v23 = vadd.f32 %v818_v20, %v598_v16  ;;  %v887_v26 = vadd.f32 %v886_v19, %v856_v18  ;;  %791 = vst [vmem:[%s1681_s22 + $0x78] sm:$0xff] %v1191_v21  ;;  %807 = vst [vmem:[%s1681_s22 + $0xf8] sm:$0xff] %v1753_v22 }
 0x140   : > { %v601_v28 = vpop.f32.mrf.mxu0  ;;  %v1765_v30 = vpop.f32.mrf.mxu1 }
 0x141   : > { %v888_v32 = vadd.f32 %v887_v26, %v857_v24  ;;  %789 = vst [vmem:[%s1681_s22 + $0x68] sm:$0xff] %v601_v28  ;;  %v820_v33 = vadd.f32 %v819_v23, %v601_v28  ;;  %v858_v34 = vmul.f32 %v601_v28, %v601_v28  ;;  %805 = vst [vmem:[%s1681_s22 + $0xe8] sm:$0xff] %v1765_v30 }
 0x142   : > { %1397 = shalt.err (!%p1394_p3)
}
 0x143   : > { %s1398_s18 = scalar_lea.hbm %s1758_s6, 4096  ;;  %s1402_s27 = scalar_lea.hbm %s1889_s2, 32768 }
 0x144   : > { %p1399_p5 = scmp.ne.s32.totalorder %s1758_s6, %s1398_s18  ;;  %p1403_p9 = scmp.lt.s32.totalorder %s1758_s6, %s1889_s2 }
 0x145   : > { %p1404_p11 = scmp.lt.s32.totalorder %s1402_s27, %s1398_s18 }
 0x146   : > { %p1400_p7 = pnand %p1399_p5, %p1905_p4 }
 0x147   : > { %p1405_p10 = por %p1404_p11, %p1403_p9 }
 0x148   : > { %p1401_p6 = pneg %p1400_p7 }
 0x14a   : > { %p1406_p1 = pnand %p1405_p10, %p1401_p6 }
 0x14c   : > { %1409 = shalt.err (!%p1406_p1)
}
 0x14d   : > { %s1505_s24 = smov 128   ;;  %s1506_s29 = smov 8   ;;  %v859_v35 = vmul.f32 %v1190_v11, %v1190_v11  ;;  %v821_v37 = vadd.f32 %v1190_v11, %v820_v33  ;;  %v889_v38 = vadd.f32 %v888_v32, %v858_v34  ;;  %v860_v39 = vmul.f32 %v1191_v21, %v1191_v21 }
 0x14e   : > { %1230 = dma.vmem_to_hbm [thread:$0]  (%p1905_p4), %s1760_s30, 4096, %s1758_s6, %s922_s21, %s1505_s24, %s1505_s24, %s1506_s29   ;;  %v861_v43 = vmul.f32 %v1686_v27, %v1686_v27  ;;  %v862_v48 = vmul.f32 %v1696_v31, %v1696_v31  ;;  %v863_v50 = vmul.f32 %v1679_v25, %v1679_v25  ;;  %v864_v54 = vmul.f32 %v1691_v29, %v1691_v29 }
 0x14f   : > { %v822_v40 = vadd.f32 %v1191_v21, %v821_v37  ;;  %v890_v42 = vadd.f32 %v889_v38, %v859_v35  ;;  %v865_v58 = vmul.f32 %v1706_v41, %v1706_v41  ;;  %v866_v62 = vmul.f32 %v1716_v51, %v1716_v51  ;;  %s1102_s30 = sshll.u32 %s1648_s11, 3  ;;  %s1131_s5 = sshll.u32 %s1490_s15, 7 }
 0x150   : > { %v869_v4 = vmul.f32 %v1726_v61, %v1726_v61  ;;  %v870_v8 = vmul.f32 %v1736_v7, %v1736_v7  ;;  %v873_v14 = vmul.f32 %v1748_v17, %v1748_v17  ;;  %v875_v18 = vmul.f32 %v1741_v12, %v1741_v12  ;;  %s251_s6 = scalar_lea.vmem [#allocation9], %s1102_s30  ;;  %s1846_s25 = scalar_lea.hbm %s1890_s3, %s1131_s5 }
 0x151   : > { %v891_v44 = vadd.f32 %v890_v42, %v860_v39  ;;  %v823_v45 = vadd.f32 %v822_v40, %v1686_v27  ;;  %v914_v32 = vlaneseq  ;;  %s958_s21 = sshll.u32 %s251_s6, 4  ;;  %s927_s8 = scalar_lea.sflag [#allocation10], %s1648_s11  ;;  %s959_s21 = int_to_ptr.vmem [resolvable:$true] %s958_s21 }
 0x152   : > { %s1410_s18 = scalar_lea.vmem %s959_s21, 128  ;;  %s1507_s15 = smov [#allocation9]  }
 0x153   : > { %v824_v47 = vadd.f32 %v823_v45, %v1696_v31  ;;  %v892_v49 = vadd.f32 %v891_v44, %v861_v43  ;;  %v915_v37 = vshrl.u32 %v914_v32, 7  ;;  %p1411_p8 = scmp.ne.s32.totalorder %s959_s21, %s1410_s18  ;;  %s1414_s4 = sshll.u32 %s1507_s15, 4  ;;  %s1415_s4 = int_to_ptr.vmem [resolvable:$false] %s1414_s4 }
 0x154   : > { %s1416_s26 = scalar_lea.vmem %s1415_s4, 256  ;;  %p1417_p0 = scmp.lt.s32.totalorder %s959_s21, %s1415_s4 }
 0x155   : > { %v825_v52 = vadd.f32 %v1679_v25, %v824_v47  ;;  %v893_v53 = vadd.f32 %v892_v49, %v862_v48  ;;  %v867_v25 = vmul.f32 %v1701_v36, %v1701_v36  ;;  %vm917_vm0 = vcmp.eq.s32.totalorder %v915_v37, 1  ;;  %p1412_p12 = pnand %p1411_p8, %p1905_p4  ;;  %p1418_p2 = scmp.lt.s32.totalorder %s1416_s26, %s1410_s18 }
 0x156   : > { %vm916_vm1 = vcmp.eq.s32.totalorder %v915_v37, 0 }
 0x157   : > { %v894_v55 = vadd.f32 %v893_v53, %v863_v50  ;;  %v826_v57 = vadd.f32 %v1691_v29, %v825_v52  ;;  %v868_v29 = vmul.f32 %v1711_v46, %v1711_v46  ;;  %p1413_p13 = pneg %p1412_p12  ;;  %p1419_p3 = por %p1418_p2, %p1417_p0 }
 0x159   : > { %v827_v27 = vadd.f32 %v826_v57, %v1706_v41  ;;  %v895_v59 = vadd.f32 %v894_v55, %v864_v54  ;;  %p1420_p5 = pnand %p1419_p3, %p1413_p13 }
 0x15b   : > { %v896_v31 = vadd.f32 %v895_v59, %v865_v58  ;;  %v828_v60 = vadd.f32 %v827_v27, %v1716_v51 }
 0x15d   : > { %v829_v63 = vadd.f32 %v1701_v36, %v828_v60  ;;  %v897_v0 = vadd.f32 %v896_v31, %v866_v62  ;;  %v871_v36 = vmul.f32 %v1721_v56, %v1721_v56 }
 0x15f   : > { %v898_v1 = vadd.f32 %v897_v0, %v867_v25  ;;  %v830_v3 = vadd.f32 %v1711_v46, %v829_v63  ;;  %v872_v46 = vmul.f32 %v1731_v2, %v1731_v2 }
 0x161   : > { %v831_v41 = vadd.f32 %v830_v3, %v1726_v61  ;;  %v899_v5 = vadd.f32 %v898_v1, %v868_v29 }
 0x163   : > { %v900_v6 = vadd.f32 %v899_v5, %v869_v4  ;;  %v832_v51 = vadd.f32 %v831_v41, %v1736_v7 }
 0x165   : > { %v833_v9 = vadd.f32 %v1721_v56, %v832_v51  ;;  %v901_v10 = vadd.f32 %v900_v6, %v870_v8  ;;  %v874_v56 = vmul.f32 %v1765_v30, %v1765_v30 }
 0x167   : > { %v902_v11 = vadd.f32 %v901_v10, %v871_v36  ;;  %v834_v13 = vadd.f32 %v1731_v2, %v833_v9  ;;  %v876_v2 = vmul.f32 %v1753_v22, %v1753_v22 }
 0x169   : > { %v835_v61 = vadd.f32 %v834_v13, %v1748_v17  ;;  %v903_v15 = vadd.f32 %v902_v11, %v872_v46 }
 0x16b   : > { %v904_v16 = vadd.f32 %v903_v15, %v873_v14  ;;  %v836_v7 = vadd.f32 %v835_v61, %v1765_v30 }
 0x16d   : > { %v837_v19 = vadd.f32 %v1741_v12, %v836_v7  ;;  %v905_v20 = vadd.f32 %v904_v16, %v874_v56 }
 0x16f   : > { %v838_v21 = vadd.f32 %v1753_v22, %v837_v19  ;;  %v906_v17 = vadd.f32 %v905_v20, %v875_v18 }
 0x171   : > { %v839_v23 = vrot.slane %v838_v21, 4  ;;  %v907_v24 = vadd.f32 %v906_v17, %v876_v2 }
 0x173   : > { %v840_v26 = vadd.f32 %v839_v23, %v838_v21  ;;  %v908_v28 = vrot.slane %v907_v24, 4 }
 0x175   : > { %v841_v33 = vrot.slane %v840_v26, 2  ;;  %v909_v30 = vadd.f32 %v908_v28, %v907_v24 }
 0x177   : > { %v842_v34 = vadd.f32 %v841_v33, %v840_v26  ;;  %v910_v35 = vrot.slane %v909_v30, 2 }
 0x179   : > { %v911_v12 = vadd.f32 %v910_v35, %v909_v30  ;;  %v843_v38 = vrot.slane %v842_v34, 1 }
 0x17b   : > { %v912_v39 = vrot.slane %v911_v12, 1  ;;  %v844_v40 = vadd.f32 %v843_v38, %v842_v34 }
 0x17d   : > { %v913_v22 = vadd.f32 %v912_v39, %v911_v12 }
 0x17f   : > { %v918_v42 = vsel %vm917_vm0, %v913_v22, 0.0 }
 0x180   : > { %v919_v43 = vsel %vm916_vm1, %v844_v40, %v918_v42 }
 0x181   : > { %920 = vst [vmem:[%s251_s6] sm:$0xff] %v919_v43 }
 0x182   : > { %1423 = shalt.err (!%p1420_p5)
}
 0x183   : > { %s1424_s27 = scalar_lea.hbm %s1846_s25, 128  ;;  %s1428_s22 = scalar_lea.hbm %s1890_s3, 1024 }
 0x184   : > { %p1425_p7 = scmp.ne.s32.totalorder %s1846_s25, %s1424_s27  ;;  %p1429_p11 = scmp.lt.s32.totalorder %s1846_s25, %s1890_s3 }
 0x185   : > { %p1430_p10 = scmp.lt.s32.totalorder %s1428_s22, %s1424_s27 }
 0x186   : > { %p1426_p6 = pnand %p1425_p7, %p1905_p4 }
 0x187   : > { %p1431_p1 = por %p1430_p10, %p1429_p11 }
 0x188   : > { %p1427_p9 = pneg %p1426_p6 }
 0x18a   : > { %p1432_p8 = pnand %p1431_p1, %p1427_p9 }
 0x18c   : > { %1435 = shalt.err (!%p1432_p8)
}
 0x18d   : > { %1231 = dma.vmem_to_hbm [thread:$0]  (%p1905_p4), %s959_s21, 128, %s1846_s25, %s927_s8  }
 0x18e PF: > { %p1252_p12 = scmp.ge.s32.totalorder %s1498_s17, 2  ;;  %s970_s30 = sand.u32 1, %s1478_s12  }
 0x18f   : > { %p1906_p13 = scmp.ne.s32.totalorder %s1897_s23, 0  ;;  %s971_s5 = scalar_lea.sflag [#allocation5], %s970_s30 }
 0x191   : > { %p1243_p0 = pnand %p1252_p12, %p1906_p13 }
 0x193   : > { %p1244_p2 = pneg %p1243_p0 }
 0x195   : > { %1469 = dma.done.wait (%p1244_p2), %s971_s5, 4096  }
 0x196   : > { %1471 = vsyncadd (%p1244_p2), %s971_s5, 4294963200  ;;  %s980_s6 = scalar_lea.sflag [#allocation10], %s970_s30 }
 0x197   : > { %1473 = dma.done.wait (%p1244_p2), %s980_s6, 128  }
 0x198   : > { %1475 = vsyncadd (%p1244_p2), %s980_s6, 4294967168  ;;  %s24_s17 = sadd.s32 1, %s1498_s17   ;;  %s1907_s12 = smov %s1482_s13 }
 0x199   : > { %p21_p3 = scmp.ge.s32.totalorder %s24_s17, 10   ;;  %s1908_s13 = smov %s1486_s14 }
 0x19a   : > { %s1909_s14 = smov %s1626_s19  ;;  %s1910_s15 = smov %s1494_s16 }
 0x19b   : > { %s1911_s16 = smov %s1913_s28  ;;  %23 = sbr.rel (!%p21_p3) target bundleno = 9 (0x9), region = 103 }
 0x1a0   :  { %985 = vsyncpa [#allocation4], 1 }
 0x1a1   :  { %987 = vsyncpa [#allocation4 + $0x1], 1 }
 0x1a2   :  { %988 = vsyncpa [#allocation7], 1 }
 0x1a3   :  { %989 = vsyncpa [#allocation5], 1 }
 0x1a4   :  { %991 = vsyncpa [#allocation5 + $0x1], 1 }
 0x1a5   :  { %992 = vsyncpa [#allocation10], 1 }
 0x1a6   :  { %994 = vsyncpa [#allocation10 + $0x1], 1 }

</bundles_post_ra>
